<compile_context>
chip_gen: v7x
topology: tpu7x:2x2x1
jax: 0.10.0
libtpu: 0.0.40
codegen_flags: <defaults>
</compile_context>

<pallas_src>
import jax
import jax.numpy as jnp
from jax import lax
from jax.experimental import pallas as pl
from jax.experimental.pallas import tpu as pltpu

# ---------------- model hyper-parameters (synthetic, small) ----------------
B = 2          # batch size
L = 8          # sequence length
D = 32         # ts_dim (embed dim)
H = 4          # num_heads
DH = D // H    # head dim
FF = 64        # hidden width of the feed-forward layer list
EPS = 1e-5     # LayerNorm eps (PyTorch default)

N = B * L                  # total rows processed at once
HN = H * N                 # rows after folding heads into the sublane axis
SCALE = 1.0 / (DH ** 0.5)  # per-head attention scale (folded into Wq/bq)
NEG = -1e30                # additive mask value (exp -> 0)

# ---- packed parameter slab layout (everything at lane offset 0) -----------
SLAB_W = 128
R_WQKV = 0                 # (D, 3D)   pre-transposed QKV weight (Q scaled)
R_WO = R_WQKV + D          # (D, D)    pre-transposed out-proj weight
R_W1 = R_WO + D            # (D, FF)   pre-transposed FF weight 1
R_W2 = R_W1 + D            # (FF, D)   pre-transposed FF weight 2
R_MASK = R_W2 + FF         # (HN, HN)  additive head/batch attention mask
R_VEC = R_MASK + HN        # (8, 128)  packed bias / affine vectors
SLAB_ROWS = R_VEC + 8      # 232 rows total (multiple of 8)

# rows of the packed bias/affine block
_BQKV, _BO, _G1, _BT1, _B1, _B2, _G2, _BT2 = range(8)


def _layernorm(x, gamma, beta):
    # PyTorch LayerNorm: biased variance, eps inside sqrt.
    mu = jnp.mean(x, axis=-1, keepdims=True)
    xc = x - mu
    var = jnp.mean(xc * xc, axis=-1, keepdims=True)
    inv = lax.rsqrt(var + EPS)
    return xc * inv * gamma + beta


def encoder_kernel(x_ref, p_ref, o_ref):
    x = x_ref[...]                                      # (N, D)

    # --- static slices of the single parameter slab (all sublane/lane-0
    #     aligned, so these are plain masked loads, no relayout) -------------
    wqkv = p_ref[R_WQKV:R_WQKV + D, 0:3 * D]            # (D, 3D), Q scale folded
    wo   = p_ref[R_WO:R_WO + D, 0:D]                    # (D, D)
    w1   = p_ref[R_W1:R_W1 + D, 0:FF]                   # (D, FF)
    w2   = p_ref[R_W2:R_W2 + FF, 0:D]                   # (FF, D)
    maskadd = p_ref[R_MASK:R_MASK + HN, 0:HN]           # (HN, HN) additive mask
    vecs = p_ref[R_VEC:R_VEC + 8, :]                    # (8, 128)

    bqkv = vecs[_BQKV:_BQKV + 1, 0:3 * D]               # (1, 3D), Q scale folded
    bo   = vecs[_BO:_BO + 1,   0:D]
    g1   = vecs[_G1:_G1 + 1,   0:D]
    bt1  = vecs[_BT1:_BT1 + 1, 0:D]
    b1   = vecs[_B1:_B1 + 1,   0:FF]
    b2   = vecs[_B2:_B2 + 1,   0:D]
    g2   = vecs[_G2:_G2 + 1,   0:D]
    bt2  = vecs[_BT2:_BT2 + 1, 0:D]

    # ---- QKV projection for all B*L rows at once ----------------------------
    qkv = jnp.dot(x, wqkv, preferred_element_type=jnp.float32) + bqkv   # (N, 3D)

    # ---- fold heads into the sublane axis: (H*N, DH) -------------------------
    # One relayout per tensor (lane slices + row concat); replaces the padded
    # (H, N, DH) 3D layout and its per-head batched matmul dispatches.
    q_f = jnp.concatenate(
        [qkv[:, h * DH:(h + 1) * DH] for h in range(H)], axis=0)        # (HN, DH)
    k_f = jnp.concatenate(
        [qkv[:, D + h * DH:D + (h + 1) * DH] for h in range(H)], axis=0)
    v_f = jnp.concatenate(
        [qkv[:, 2 * D + h * DH:2 * D + (h + 1) * DH] for h in range(H)], axis=0)

    # ---- single score matmul over all heads/batches; additive mask kills
    #      cross-(head,batch) pairs -------------------------------------------
    s = lax.dot_general(q_f, k_f, (((1,), (1,)), ((), ())),
                        preferred_element_type=jnp.float32) + maskadd   # (HN, HN)

    # numerically-stable softmax; reciprocal on the (otherwise idle) EUP slot
    s = s - jnp.max(s, axis=-1, keepdims=True)
    p = jnp.exp(s)
    p = p * pl.reciprocal(jnp.sum(p, axis=-1, keepdims=True), approx=True)

    # ---- single PV matmul -----------------------------------------------------
    oh = jnp.dot(p, v_f, preferred_element_type=jnp.float32)            # (HN, DH)

    # ---- output projection, folded per head via free sublane row slices ------
    attn = jnp.dot(oh[0:N, :], wo[0:DH, :], preferred_element_type=jnp.float32)
    for h in range(1, H):
        attn = attn + jnp.dot(oh[h * N:(h + 1) * N, :],
                              wo[h * DH:(h + 1) * DH, :],
                              preferred_element_type=jnp.float32)
    attn = attn + bo                                                    # (N, D)

    # ---- residual + LayerNorm 1 ----------------------------------------------
    x1 = _layernorm(x + attn, g1, bt1)                                  # (N, D)

    # ---- feed-forward: Linear(D->FF) -> ReLU -> Linear(FF->D) ----------------
    hdd = jnp.dot(x1, w1, preferred_element_type=jnp.float32) + b1
    hdd = jnp.maximum(hdd, 0.0)
    ff = jnp.dot(hdd, w2, preferred_element_type=jnp.float32) + b2

    # ---- residual + LayerNorm 2 ----------------------------------------------
    y = _layernorm(x1 + ff, g2, bt2)

    o_ref[...] = y.astype(o_ref.dtype)


def _pack_vec(v, width=SLAB_W):
    v = v.reshape(-1).astype(jnp.float32)
    return jnp.pad(v, (0, width - v.shape[0]))


def ts_encoder_pallas(x, params):
    (wqkv, bqkv, wo, bo, g1, bt1, w1, b1, w2, b2, g2, bt2) = params
    Bx, Lx, Dx = x.shape
    x2 = x.reshape(Bx * Lx, Dx)

    # Pre-transpose weights (free at trace time) -> MXU-natural layout.
    # Fold the 1/sqrt(DH) query scale into the Q columns of wqkv_t and the
    # Q third of bqkv (deletes the in-kernel q*SCALE multiply).
    wqkv_t = wqkv.T                              # (D, 3D)
    wqkv_t = wqkv_t.at[:, 0:D].multiply(SCALE)
    bqkv_s = bqkv.at[:, 0:D].multiply(SCALE)     # (1, 3D)
    wo_t = wo.T                                  # (D, D)
    w1_t = w1.T                                  # (D, FF)
    w2_t = w2.T                                  # (FF, D)

    # Precompute the additive head/batch mask for the head-folded row order
    # (row = h*N + b*L + l  =>  group id = row // L = h*B + b).
    gid = jnp.arange(HN) // L
    maskadd = jnp.where(gid[:, None] == gid[None, :], 0.0, NEG).astype(jnp.float32)

    # Packed bias / affine vectors (8, 128).
    vecs = jnp.stack([_pack_vec(bqkv_s), _pack_vec(bo), _pack_vec(g1),
                      _pack_vec(bt1), _pack_vec(b1), _pack_vec(b2),
                      _pack_vec(g2), _pack_vec(bt2)], axis=0)

    # Coalesce ALL parameters into one lane-dense (SLAB_ROWS, 128) slab
    # -> one DMA descriptor; every block starts at lane 0 on an 8-row boundary.
    slab = jnp.zeros((SLAB_ROWS, SLAB_W), jnp.float32)
    slab = slab.at[R_WQKV:R_WQKV + D, 0:3 * D].set(wqkv_t)
    slab = slab.at[R_WO:R_WO + D, 0:D].set(wo_t)
    slab = slab.at[R_W1:R_W1 + D, 0:FF].set(w1_t)
    slab = slab.at[R_W2:R_W2 + FF, 0:D].set(w2_t)
    slab = slab.at[R_MASK:R_MASK + HN, 0:HN].set(maskadd)
    slab = slab.at[R_VEC:R_VEC + 8, :].set(vecs)

    vmem = pl.BlockSpec(memory_space=pltpu.MemorySpace.VMEM)
    out = pl.pallas_call(
        encoder_kernel,
        out_shape=jax.ShapeDtypeStruct((Bx * Lx, Dx), x.dtype),
        in_specs=[vmem, vmem],
        out_specs=vmem,
    )(x2, slab)
    return out.reshape(Bx, Lx, Dx)


# ---------------------- pure-JAX reference (for checking) -------------------
def ts_encoder_ref(x, params):
    (wqkv, bqkv, wo, bo, g1, bt1, w1, b1, w2, b2, g2, bt2) = params

    def ln(t, g, b):
        mu = jnp.mean(t, axis=-1, keepdims=True)
        var = jnp.mean((t - mu) ** 2, axis=-1, keepdims=True)
        return (t - mu) / jnp.sqrt(var + EPS) * g + b

    qkv = jnp.einsum('bld,ed->ble', x, wqkv) + bqkv[0]
    q, k, v = jnp.split(qkv, 3, axis=-1)
    q = q.reshape(B, L, H, DH).transpose(0, 2, 1, 3) / (DH ** 0.5)
    k = k.reshape(B, L, H, DH).transpose(0, 2, 1, 3)
    v = v.reshape(B, L, H, DH).transpose(0, 2, 1, 3)
    s = jnp.einsum('bhqd,bhkd->bhqk', q, k)
    p = jax.nn.softmax(s, axis=-1)
    a = jnp.einsum('bhqk,bhkd->bhqd', p, v).transpose(0, 2, 1, 3).reshape(B, L, D)
    a = jnp.einsum('bld,ed->ble', a, wo) + bo[0]
    x1 = ln(x + a, g1[0], bt1[0])
    hdd = jax.nn.relu(jnp.einsum('bld,fd->blf', x1, w1) + b1[0])
    ff = jnp.einsum('blf,df->bld', hdd, w2) + b2[0]
    return ln(x1 + ff, g2[0], bt2[0])


def make_params(key):
    ks = jax.random.split(key, 8)
    wqkv = jax.random.normal(ks[0], (3 * D, D), jnp.float32) * 0.1
    bqkv = jax.random.normal(ks[1], (1, 3 * D), jnp.float32) * 0.05
    wo = jax.random.normal(ks[2], (D, D), jnp.float32) * 0.1
    bo = jax.random.normal(ks[3], (1, D), jnp.float32) * 0.05
    g1 = jnp.ones((1, D), jnp.float32)
    bt1 = jnp.zeros((1, D), jnp.float32)
    w1 = jax.random.normal(ks[4], (FF, D), jnp.float32) * 0.1
    b1 = jax.random.normal(ks[5], (1, FF), jnp.float32) * 0.05
    w2 = jax.random.normal(ks[6], (D, FF), jnp.float32) * 0.1
    b2 = jax.random.normal(ks[7], (1, D), jnp.float32) * 0.05
    g2 = jnp.ones((1, D), jnp.float32)
    bt2 = jnp.zeros((1, D), jnp.float32)
    return (wqkv, bqkv, wo, bo, g1, bt1, w1, b1, w2, b2, g2, bt2)


if __name__ == "__main__":
    key = jax.random.PRNGKey(0)
    kx, kp = jax.random.split(key)
    x = jax.random.normal(kx, (B, L, D), jnp.float32)
    params = make_params(kp)

    fn = jax.jit(ts_encoder_pallas)
    out = jax.block_until_ready(fn(x, params))

    ref = ts_encoder_ref(x, params)
    assert out.shape == (B, L, D)
    # tolerance includes slack for the EUP approximate reciprocal in softmax
    assert jnp.allclose(out, ref, atol=1e-3, rtol=1e-3), \
        f"max abs err {jnp.max(jnp.abs(out - ref))}"

    print("KERNEL_OK")
</pallas_src>

<mosaic_0001>
module attributes {stable_mosaic.version = 11 : i64} {
  func.func @encoder_kernel(%arg0: memref<16x32xf32, #tpu.memory_space<vmem>>, %arg1: memref<232x128xf32, #tpu.memory_space<vmem>>, %arg2: memref<16x32xf32, #tpu.memory_space<vmem>>) attributes {dimension_semantics = [], scalar_prefetch = 0 : i64, scratch_operands = 0 : i64, tpu.core_type = #tpu.core_type<tc>} {
    %c0 = arith.constant 0 : index
    %c0_0 = arith.constant 0 : index
    %0 = vector.load %arg0[%c0, %c0_0] : memref<16x32xf32, #tpu.memory_space<vmem>>, vector<16x32xf32>
    %c0_1 = arith.constant 0 : index
    %c0_2 = arith.constant 0 : index
    %1 = vector.load %arg1[%c0_1, %c0_2] : memref<232x128xf32, #tpu.memory_space<vmem>>, vector<32x96xf32>
    %c32 = arith.constant 32 : index
    %c0_3 = arith.constant 0 : index
    %2 = vector.load %arg1[%c32, %c0_3] : memref<232x128xf32, #tpu.memory_space<vmem>>, vector<32x32xf32>
    %c64 = arith.constant 64 : index
    %c0_4 = arith.constant 0 : index
    %3 = vector.load %arg1[%c64, %c0_4] : memref<232x128xf32, #tpu.memory_space<vmem>>, vector<32x64xf32>
    %c96 = arith.constant 96 : index
    %c0_5 = arith.constant 0 : index
    %4 = vector.load %arg1[%c96, %c0_5] : memref<232x128xf32, #tpu.memory_space<vmem>>, vector<64x32xf32>
    %c160 = arith.constant 160 : index
    %c0_6 = arith.constant 0 : index
    %5 = vector.load %arg1[%c160, %c0_6] : memref<232x128xf32, #tpu.memory_space<vmem>>, vector<64x64xf32>
    %c224 = arith.constant 224 : index
    %c0_7 = arith.constant 0 : index
    %6 = vector.load %arg1[%c224, %c0_7] : memref<232x128xf32, #tpu.memory_space<vmem>>, vector<8x128xf32>
    %7 = vector.extract_strided_slice %6 {offsets = [0, 0], sizes = [1, 96], strides = [1, 1]} : vector<8x128xf32> to vector<1x96xf32>
    %8 = vector.extract_strided_slice %6 {offsets = [1, 0], sizes = [1, 32], strides = [1, 1]} : vector<8x128xf32> to vector<1x32xf32>
    %9 = vector.extract_strided_slice %6 {offsets = [2, 0], sizes = [1, 32], strides = [1, 1]} : vector<8x128xf32> to vector<1x32xf32>
    %10 = vector.extract_strided_slice %6 {offsets = [3, 0], sizes = [1, 32], strides = [1, 1]} : vector<8x128xf32> to vector<1x32xf32>
    %11 = vector.extract_strided_slice %6 {offsets = [4, 0], sizes = [1, 64], strides = [1, 1]} : vector<8x128xf32> to vector<1x64xf32>
    %12 = vector.extract_strided_slice %6 {offsets = [5, 0], sizes = [1, 32], strides = [1, 1]} : vector<8x128xf32> to vector<1x32xf32>
    %13 = vector.extract_strided_slice %6 {offsets = [6, 0], sizes = [1, 32], strides = [1, 1]} : vector<8x128xf32> to vector<1x32xf32>
    %14 = vector.extract_strided_slice %6 {offsets = [7, 0], sizes = [1, 32], strides = [1, 1]} : vector<8x128xf32> to vector<1x32xf32>
    %cst = arith.constant dense<0.000000e+00> : vector<16x96xf32>
    %15 = tpu.matmul %0, %1, %cst {dimension_numbers = #tpu.dot_dimension_numbers<[1], [0], [0], [1], [0, 0, 1, 1], [], []>} : vector<16x32xf32>, vector<32x96xf32>, vector<16x96xf32> -> vector<16x96xf32>
    %16 = vector.broadcast %7 : vector<1x96xf32> to vector<16x96xf32>
    %17 = arith.addf %15, %16 : vector<16x96xf32>
    %18 = vector.extract_strided_slice %17 {offsets = [0, 0], sizes = [16, 8], strides = [1, 1]} : vector<16x96xf32> to vector<16x8xf32>
    %19 = vector.extract_strided_slice %17 {offsets = [0, 8], sizes = [16, 8], strides = [1, 1]} : vector<16x96xf32> to vector<16x8xf32>
    %20 = vector.extract_strided_slice %17 {offsets = [0, 16], sizes = [16, 8], strides = [1, 1]} : vector<16x96xf32> to vector<16x8xf32>
    %21 = vector.extract_strided_slice %17 {offsets = [0, 24], sizes = [16, 8], strides = [1, 1]} : vector<16x96xf32> to vector<16x8xf32>
    %22 = tpu.concatenate %18, %19, %20, %21 in 0 : vector<16x8xf32>, vector<16x8xf32>, vector<16x8xf32>, vector<16x8xf32> -> vector<64x8xf32>
    %23 = vector.extract_strided_slice %17 {offsets = [0, 32], sizes = [16, 8], strides = [1, 1]} : vector<16x96xf32> to vector<16x8xf32>
    %24 = vector.extract_strided_slice %17 {offsets = [0, 40], sizes = [16, 8], strides = [1, 1]} : vector<16x96xf32> to vector<16x8xf32>
    %25 = vector.extract_strided_slice %17 {offsets = [0, 48], sizes = [16, 8], strides = [1, 1]} : vector<16x96xf32> to vector<16x8xf32>
    %26 = vector.extract_strided_slice %17 {offsets = [0, 56], sizes = [16, 8], strides = [1, 1]} : vector<16x96xf32> to vector<16x8xf32>
    %27 = tpu.concatenate %23, %24, %25, %26 in 0 : vector<16x8xf32>, vector<16x8xf32>, vector<16x8xf32>, vector<16x8xf32> -> vector<64x8xf32>
    %28 = vector.extract_strided_slice %17 {offsets = [0, 64], sizes = [16, 8], strides = [1, 1]} : vector<16x96xf32> to vector<16x8xf32>
    %29 = vector.extract_strided_slice %17 {offsets = [0, 72], sizes = [16, 8], strides = [1, 1]} : vector<16x96xf32> to vector<16x8xf32>
    %30 = vector.extract_strided_slice %17 {offsets = [0, 80], sizes = [16, 8], strides = [1, 1]} : vector<16x96xf32> to vector<16x8xf32>
    %31 = vector.extract_strided_slice %17 {offsets = [0, 88], sizes = [16, 8], strides = [1, 1]} : vector<16x96xf32> to vector<16x8xf32>
    %32 = tpu.concatenate %28, %29, %30, %31 in 0 : vector<16x8xf32>, vector<16x8xf32>, vector<16x8xf32>, vector<16x8xf32> -> vector<64x8xf32>
    %cst_8 = arith.constant dense<0.000000e+00> : vector<64x64xf32>
    %33 = tpu.matmul %22, %27, %cst_8 {dimension_numbers = #tpu.dot_dimension_numbers<[1], [1], [0], [0], [0, 0, 1, 0], [], []>} : vector<64x8xf32>, vector<64x8xf32>, vector<64x64xf32> -> vector<64x64xf32>
    %34 = arith.addf %33, %5 : vector<64x64xf32>
    %cst_9 = arith.constant dense<0xFF800000> : vector<64xf32>
    %35 = vector.multi_reduction <maximumf>, %34, %cst_9 [1] : vector<64x64xf32> to vector<64xf32>
    %36 = vector.shape_cast %35 : vector<64xf32> to vector<64x1xf32>
    %37 = vector.broadcast %36 : vector<64x1xf32> to vector<64x64xf32>
    %38 = arith.subf %34, %37 : vector<64x64xf32>
    %39 = math.exp %38 : vector<64x64xf32>
    %cst_10 = arith.constant dense<0.000000e+00> : vector<64xf32>
    %40 = vector.multi_reduction <add>, %39, %cst_10 [1] : vector<64x64xf32> to vector<64xf32>
    %41 = vector.shape_cast %40 : vector<64xf32> to vector<64x1xf32>
    %42 = tpu.reciprocal %41 {approx = true} : vector<64x1xf32> -> vector<64x1xf32>
    %43 = vector.broadcast %42 : vector<64x1xf32> to vector<64x64xf32>
    %44 = arith.mulf %39, %43 : vector<64x64xf32>
    %cst_11 = arith.constant dense<0.000000e+00> : vector<64x8xf32>
    %45 = tpu.matmul %44, %32, %cst_11 {dimension_numbers = #tpu.dot_dimension_numbers<[1], [0], [0], [1], [0, 0, 1, 1], [], []>} : vector<64x64xf32>, vector<64x8xf32>, vector<64x8xf32> -> vector<64x8xf32>
    %46 = vector.extract_strided_slice %45 {offsets = [0, 0], sizes = [16, 8], strides = [1, 1]} : vector<64x8xf32> to vector<16x8xf32>
    %47 = vector.extract_strided_slice %2 {offsets = [0, 0], sizes = [8, 32], strides = [1, 1]} : vector<32x32xf32> to vector<8x32xf32>
    %cst_12 = arith.constant dense<0.000000e+00> : vector<16x32xf32>
    %48 = tpu.matmul %46, %47, %cst_12 {dimension_numbers = #tpu.dot_dimension_numbers<[1], [0], [0], [1], [0, 0, 1, 1], [], []>} : vector<16x8xf32>, vector<8x32xf32>, vector<16x32xf32> -> vector<16x32xf32>
    %49 = vector.extract_strided_slice %45 {offsets = [16, 0], sizes = [16, 8], strides = [1, 1]} : vector<64x8xf32> to vector<16x8xf32>
    %50 = vector.extract_strided_slice %2 {offsets = [8, 0], sizes = [8, 32], strides = [1, 1]} : vector<32x32xf32> to vector<8x32xf32>
    %cst_13 = arith.constant dense<0.000000e+00> : vector<16x32xf32>
    %51 = tpu.matmul %49, %50, %cst_13 {dimension_numbers = #tpu.dot_dimension_numbers<[1], [0], [0], [1], [0, 0, 1, 1], [], []>} : vector<16x8xf32>, vector<8x32xf32>, vector<16x32xf32> -> vector<16x32xf32>
    %52 = arith.addf %48, %51 : vector<16x32xf32>
    %53 = vector.extract_strided_slice %45 {offsets = [32, 0], sizes = [16, 8], strides = [1, 1]} : vector<64x8xf32> to vector<16x8xf32>
    %54 = vector.extract_strided_slice %2 {offsets = [16, 0], sizes = [8, 32], strides = [1, 1]} : vector<32x32xf32> to vector<8x32xf32>
    %cst_14 = arith.constant dense<0.000000e+00> : vector<16x32xf32>
    %55 = tpu.matmul %53, %54, %cst_14 {dimension_numbers = #tpu.dot_dimension_numbers<[1], [0], [0], [1], [0, 0, 1, 1], [], []>} : vector<16x8xf32>, vector<8x32xf32>, vector<16x32xf32> -> vector<16x32xf32>
    %56 = arith.addf %52, %55 : vector<16x32xf32>
    %57 = vector.extract_strided_slice %45 {offsets = [48, 0], sizes = [16, 8], strides = [1, 1]} : vector<64x8xf32> to vector<16x8xf32>
    %58 = vector.extract_strided_slice %2 {offsets = [24, 0], sizes = [8, 32], strides = [1, 1]} : vector<32x32xf32> to vector<8x32xf32>
    %cst_15 = arith.constant dense<0.000000e+00> : vector<16x32xf32>
    %59 = tpu.matmul %57, %58, %cst_15 {dimension_numbers = #tpu.dot_dimension_numbers<[1], [0], [0], [1], [0, 0, 1, 1], [], []>} : vector<16x8xf32>, vector<8x32xf32>, vector<16x32xf32> -> vector<16x32xf32>
    %60 = arith.addf %56, %59 : vector<16x32xf32>
    %61 = vector.broadcast %8 : vector<1x32xf32> to vector<16x32xf32>
    %62 = arith.addf %60, %61 : vector<16x32xf32>
    %63 = arith.addf %0, %62 : vector<16x32xf32>
    %cst_16 = arith.constant dense<0.000000e+00> : vector<16xf32>
    %64 = vector.multi_reduction <add>, %63, %cst_16 [1] : vector<16x32xf32> to vector<16xf32>
    %65 = vector.shape_cast %64 : vector<16xf32> to vector<16x1xf32>
    %cst_17 = arith.constant 3.200000e+01 : f32
    %66 = vector.broadcast %cst_17 : f32 to vector<16x1xf32>
    %67 = arith.divf %65, %66 : vector<16x1xf32>
    %68 = vector.broadcast %67 : vector<16x1xf32> to vector<16x32xf32>
    %69 = arith.subf %63, %68 : vector<16x32xf32>
    %70 = arith.mulf %69, %69 : vector<16x32xf32>
    %cst_18 = arith.constant dense<0.000000e+00> : vector<16xf32>
    %71 = vector.multi_reduction <add>, %70, %cst_18 [1] : vector<16x32xf32> to vector<16xf32>
    %72 = vector.shape_cast %71 : vector<16xf32> to vector<16x1xf32>
    %cst_19 = arith.constant 3.200000e+01 : f32
    %73 = vector.broadcast %cst_19 : f32 to vector<16x1xf32>
    %74 = arith.divf %72, %73 : vector<16x1xf32>
    %cst_20 = arith.constant 9.99999974E-6 : f32
    %75 = vector.broadcast %cst_20 : f32 to vector<16x1xf32>
    %76 = arith.addf %74, %75 : vector<16x1xf32>
    %77 = math.rsqrt %76 : vector<16x1xf32>
    %78 = vector.broadcast %77 : vector<16x1xf32> to vector<16x32xf32>
    %79 = arith.mulf %69, %78 : vector<16x32xf32>
    %80 = vector.broadcast %9 : vector<1x32xf32> to vector<16x32xf32>
    %81 = arith.mulf %79, %80 : vector<16x32xf32>
    %82 = vector.broadcast %10 : vector<1x32xf32> to vector<16x32xf32>
    %83 = arith.addf %81, %82 : vector<16x32xf32>
    %cst_21 = arith.constant dense<0.000000e+00> : vector<16x64xf32>
    %84 = tpu.matmul %83, %3, %cst_21 {dimension_numbers = #tpu.dot_dimension_numbers<[1], [0], [0], [1], [0, 0, 1, 1], [], []>} : vector<16x32xf32>, vector<32x64xf32>, vector<16x64xf32> -> vector<16x64xf32>
    %85 = vector.broadcast %11 : vector<1x64xf32> to vector<16x64xf32>
    %86 = arith.addf %84, %85 : vector<16x64xf32>
    %cst_22 = arith.constant 0.000000e+00 : f32
    %87 = vector.broadcast %cst_22 : f32 to vector<16x64xf32>
    %88 = arith.maximumf %86, %87 : vector<16x64xf32>
    %cst_23 = arith.constant dense<0.000000e+00> : vector<16x32xf32>
    %89 = tpu.matmul %88, %4, %cst_23 {dimension_numbers = #tpu.dot_dimension_numbers<[1], [0], [0], [1], [0, 0, 1, 1], [], []>} : vector<16x64xf32>, vector<64x32xf32>, vector<16x32xf32> -> vector<16x32xf32>
    %90 = vector.broadcast %12 : vector<1x32xf32> to vector<16x32xf32>
    %91 = arith.addf %89, %90 : vector<16x32xf32>
    %92 = arith.addf %83, %91 : vector<16x32xf32>
    %cst_24 = arith.constant dense<0.000000e+00> : vector<16xf32>
    %93 = vector.multi_reduction <add>, %92, %cst_24 [1] : vector<16x32xf32> to vector<16xf32>
    %94 = vector.shape_cast %93 : vector<16xf32> to vector<16x1xf32>
    %cst_25 = arith.constant 3.200000e+01 : f32
    %95 = vector.broadcast %cst_25 : f32 to vector<16x1xf32>
    %96 = arith.divf %94, %95 : vector<16x1xf32>
    %97 = vector.broadcast %96 : vector<16x1xf32> to vector<16x32xf32>
    %98 = arith.subf %92, %97 : vector<16x32xf32>
    %99 = arith.mulf %98, %98 : vector<16x32xf32>
    %cst_26 = arith.constant dense<0.000000e+00> : vector<16xf32>
    %100 = vector.multi_reduction <add>, %99, %cst_26 [1] : vector<16x32xf32> to vector<16xf32>
    %101 = vector.shape_cast %100 : vector<16xf32> to vector<16x1xf32>
    %cst_27 = arith.constant 3.200000e+01 : f32
    %102 = vector.broadcast %cst_27 : f32 to vector<16x1xf32>
    %103 = arith.divf %101, %102 : vector<16x1xf32>
    %cst_28 = arith.constant 9.99999974E-6 : f32
    %104 = vector.broadcast %cst_28 : f32 to vector<16x1xf32>
    %105 = arith.addf %103, %104 : vector<16x1xf32>
    %106 = math.rsqrt %105 : vector<16x1xf32>
    %107 = vector.broadcast %106 : vector<16x1xf32> to vector<16x32xf32>
    %108 = arith.mulf %98, %107 : vector<16x32xf32>
    %109 = vector.broadcast %13 : vector<1x32xf32> to vector<16x32xf32>
    %110 = arith.mulf %108, %109 : vector<16x32xf32>
    %111 = vector.broadcast %14 : vector<1x32xf32> to vector<16x32xf32>
    %112 = arith.addf %110, %111 : vector<16x32xf32>
    %c0_29 = arith.constant 0 : index
    %c0_30 = arith.constant 0 : index
    %113 = vector.load %arg2[%c0_29, %c0_30] : memref<16x32xf32, #tpu.memory_space<vmem>>, vector<16x32xf32>
    tpu.vector_store %arg2[%c0_29, %c0_30], %112 {strides = array<i32>} : memref<16x32xf32, #tpu.memory_space<vmem>>, vector<16x32xf32>,
    return
  }
}

</mosaic_0001>

<bundles_post_ra>
// kernel: ts_encoder_pallas.1
= control target key start
LH: loop header
LB: loop body
LE: loop exit
PB: predicated region body
PF: predicated region fallthrough
CT: control target
= control target key end

     0   :  { %vm47_vm0 = vcmask 261120   ;;  %s1833_s0 = inlined_call_operand.vmem [shape: f32[16,32], index: 0, kind: input, shape index: {}]   ;;  %s1834_s1 = inlined_call_operand.vmem [shape: f32[232,128], index: 1, kind: input, shape index: {}]   ;;  %s1835_s2 = inlined_call_operand.hbm [shape: f32[16,32], index: 2, kind: output, shape index: {}]  }
   0x1   :  { %v14_v0 = vld [vmem:[%s1834_s1] sm:$0xff]  ;;  %v15_v1 = vld [vmem:[%s1834_s1 + $0x8] sm:$0xff]  ;;  %v16_v2 = vld [vmem:[%s1834_s1 + $0x10] sm:$0xff] }
   0x2   :  { %v1365_v3 = vpack.c.bf16 %v15_v1, %v14_v0  ;;  %v17_v4 = vld [vmem:[%s1834_s1 + $0x18] sm:$0xff]  ;;  %v1593_v5 = vld [vmem:[%s1833_s0] sm:$0xff] }
   0x3   :  { %v1369_v6 = vpack.c.bf16 %v17_v4, %v16_v2  ;;  %1256 = vmatprep.mubr.msk.f32.mxu1 %vm47_vm0, %v1593_v5 }
   0x4   :  { %7 = vsyncpa [#allocation3], 0  ;;  %1366 = vmatprep.subr.bf16.mxu1 %v1365_v3  ;;  %v1600_v7 = vld [vmem:[%s1833_s0 + $0x8] sm:$0xff]  ;;  %v43_v8 = vlaneseq  ;;  %v1610_v11 = vld [vmem:[%s1834_s1 + $0xe0] sm:$0xff]  ;;  %vm159_vm1 = vcmask 64512   ;;  %s1555_s0 = smov 112  }
   0x5   :  { %1368 = vmatpush3.bf16.msra.mxu1 %v1365_v3  ;;  %s1556_s23 = smov 120   ;;  %s1557_s24 = smov 104   ;;  %vm1628_vm2 = vmpackc.low %vm159_vm1, %vm159_vm1  ;;  %v35_v44 = vld [vmem:[%s1834_s1 + $0xa8] sm:$0xff]  ;;  %v34_v45 = vld [vmem:[%s1834_s1 + $0xa0] sm:$0xff]  ;;  %vm297_vm3 = vcmask 523264  }
   0x6   :  { %1370 = vmatprep.subr.bf16.mxu1 %v1369_v6  ;;  %v1604_v9 = vshrl.u32 %v43_v8, 7  ;;  %s1558_s25 = smov 96   ;;  %v36_v51 = vld [vmem:[%s1834_s1 + $0xb0] sm:$0xff]  ;;  %v37_v54 = vld [vmem:[%s1834_s1 + $0xb8] sm:$0xff]  ;;  %v38_v57 = vld [vmem:[%s1834_s1 + $0xc0] sm:$0xff]  ;;  %s1559_s14 = smov 64  }
   0x7   :  { %v39_v61 = vld [vmem:[%s1834_s1 + $0xc8] sm:$0xff]  ;;  %v40_v0 = vld [vmem:[%s1834_s1 + $0xd0] sm:$0xff] }
   0x8   :  { %v45_v10 = vsub.s32 0, %v1604_v9 }
   0x9   :  { %1372 = vmatpush3.bf16.msra.mxu1 %v1369_v6  ;;  %v41_v6 = vld [vmem:[%s1834_s1 + $0xd8] sm:$0xff] }
   0xa   :  { %v46_v12 = vrot.slane %v1610_v11, %v45_v10 }
   0xc   :  { %1257 = vmatmul.mubr.msk.f32.vlgmr.msra.gmra.mrb[0].mxu1 %vm47_vm0, %v1600_v7 }
  0xdf   :  { %v1258_v13 = vpop.f32.mrb[0].mxu1 }
  0xe0   :  { %v120_v14 = vpop.f32.mrb[1].mxu1  ;;  %v126_v16 = vadd.f32 %v1258_v13, %v46_v12 }
  0xe1   :  { %v121_v15 = vadd.f32 %v120_v14, %v46_v12 }
  0xe3   :  { %135 = vrot.lane.b32.xlu1 %v121_v15, %s1555_s0  ;;  %131 = vrot.lane.b32.xlu0 %v121_v15, %s1556_s23  ;;  %v1614_v17 = vpack.i.bf16 %v126_v16, %v121_v15 }
  0xe4   :  { %1275 = vmatprep.mubr.msk.f32.mxu1 %vm159_vm1, %v121_v15 }
  0xe7   :  { %137 = vrot.lane.b32.xlu1 %v126_v16, %s1555_s0  ;;  %133 = vrot.lane.b32.xlu0 %v126_v16, %s1556_s23 }
  0xeb   :  { %141 = vrot.lane.b32.xlu1 %v126_v16, %s1557_s24  ;;  %139 = vrot.lane.b32.xlu0 %v121_v15, %s1557_s24 }
  0xef   :  { %1452 = vrot.lane.b32.xlu0 %v1614_v17, %s1558_s25 }
 0x155   :  { %v136_v18 = vpop.permute.xlu1 %135  ;;  %v132_v19 = vpop.permute.xlu0 %131 }
 0x159   :  { %v138_v20 = vpop.permute.xlu1 %137  ;;  %v134_v21 = vpop.permute.xlu0 %133 }
 0x15a   :  { %v1617_v22 = vpack.i.bf16 %v138_v20, %v136_v18  ;;  %v1619_v23 = vpack.i.bf16 %v134_v21, %v132_v19 }
 0x15c   :  { %1462 = vrot.lane.b32.xlu0 %v1617_v22, %s1558_s25  ;;  %1457 = vrot.lane.b32.xlu1 %v1619_v23, %s1558_s25 }
 0x15d   :  { %v142_v24 = vpop.permute.xlu1 %141  ;;  %v140_v25 = vpop.permute.xlu0 %139 }
 0x15e   :  { %v1623_v26 = vpack.i.bf16 %v142_v24, %v140_v25 }
 0x160   :  { %1467 = vrot.lane.b32.xlu1 %v1623_v26, %s1558_s25 }
 0x161   :  { %v1453_v27 = vpop.permute.xlu0 %1452 }
 0x162   :  { %v1455_v28 = vunpack.i.h.bf16 %v1453_v27  ;;  %v1454_v29 = vunpack.i.l.bf16 %v1453_v27 }
 0x164   :  { %v1373_v31 = vpack.c.bf16 %v1455_v28, %v1454_v29 }
 0x166   :  { %1375 = vmatprep.subr.msk.bf16.mxu1 %vm1628_vm2, %v1373_v31 }
 0x167   :  { %1378 = vmatpush3.bf16.xpose.msk.msra.mxu1 %vm1628_vm2, %v1373_v31 }
 0x1ce   :  { %v1458_v32 = vpop.permute.xlu1 %1457  ;;  %v1463_v33 = vpop.permute.xlu0 %1462 }
 0x1cf   :  { %v1460_v34 = vunpack.i.h.bf16 %v1458_v32  ;;  %v1459_v35 = vunpack.i.l.bf16 %v1458_v32  ;;  %v1465_v36 = vunpack.i.h.bf16 %v1463_v33  ;;  %v1464_v37 = vunpack.i.l.bf16 %v1463_v33 }
 0x1d1   :  { %v1379_v38 = vpack.c.bf16 %v1460_v34, %v1459_v35  ;;  %v1385_v39 = vpack.c.bf16 %v1465_v36, %v1464_v37 }
 0x1d2   :  { %v1468_v40 = vpop.permute.xlu1 %1467 }
 0x1d3   :  { %1381 = vmatprep.subr.msk.bf16.mxu1 %vm1628_vm2, %v1379_v38  ;;  %v1470_v41 = vunpack.i.h.bf16 %v1468_v40  ;;  %v1469_v42 = vunpack.i.l.bf16 %v1468_v40 }
 0x1d4   :  { %1384 = vmatpush3.bf16.xpose.msk.msra.mxu1 %vm1628_vm2, %v1379_v38 }
 0x1d5   :  { %1387 = vmatprep.subr.msk.bf16.mxu1 %vm1628_vm2, %v1385_v39  ;;  %v1391_v43 = vpack.c.bf16 %v1470_v41, %v1469_v42 }
 0x1dc   :  { %1390 = vmatpush3.bf16.xpose.msk.msra.mxu1 %vm1628_vm2, %v1385_v39 }
 0x1dd   :  { %1393 = vmatprep.subr.msk.bf16.mxu1 %vm1628_vm2, %v1391_v43 }
 0x1e4   :  { %1396 = vmatpush3.bf16.xpose.msk.msra.mxu1 %vm1628_vm2, %v1391_v43 }
 0x1eb   :  { %1276 = vmatmul.mubr.msk.f32.vlgmr.msra.gmra.mrb[2].mxu1 %vm159_vm1, %v126_v16 }
 0x1ec   :  { %1278 = vmatprep.mubr.msk.f32.mxu1 %vm159_vm1, %v132_v19 }
 0x1ef   :  { %1279 = vmatmul.mubr.msk.f32.gmra.mrb[4].mxu1 %vm159_vm1, %v134_v21 }
 0x1f0   :  { %1281 = vmatprep.mubr.msk.f32.mxu1 %vm159_vm1, %v136_v18 }
 0x1f3   :  { %1282 = vmatmul.mubr.msk.f32.gmra.mrb[6].mxu1 %vm159_vm1, %v138_v20 }
 0x1f4   :  { %1284 = vmatprep.mubr.msk.f32.mxu1 %vm159_vm1, %v140_v25 }
 0x1f7   :  { %1285 = vmatmul.mubr.msk.f32.gmra.mrb[8].mxu1 %vm159_vm1, %v142_v24 }
 0x2be   :  { %v1277_v46 = vpop.f32.mrb[2].mxu1 }
 0x2bf   :  { %v264_v47 = vadd.f32 %v1277_v46, %v35_v44  ;;  %v258_v48 = vpop.f32.mrb[3].mxu1 }
 0x2c0   :  { %v259_v49 = vadd.f32 %v258_v48, %v34_v45 }
 0x2c1   :  { %v301_v50 = vsel %vm297_vm3, %v264_v47, -inf }
 0x2c2   :  { %302 = vmax.xlane.f32.xlu1 %v301_v50  ;;  %v1280_v52 = vpop.f32.mrb[4].mxu1  ;;  %v298_v53 = vsel %vm297_vm3, %v259_v49, -inf }
 0x2c3   :  { %v268_v55 = vpop.f32.mrb[5].mxu1  ;;  %299 = vmax.xlane.f32.xlu0 %v298_v53  ;;  %v274_v58 = vadd.f32 %v1280_v52, %v37_v54 }
 0x2c4   :  { %v269_v56 = vadd.f32 %v268_v55, %v36_v51 }
 0x2c5   :  { %v307_v4 = vsel %vm297_vm3, %v274_v58, -inf }
 0x2c6   :  { %v1283_v59 = vpop.f32.mrb[6].mxu1  ;;  %v304_v60 = vsel %vm297_vm3, %v269_v56, -inf }
 0x2c7   :  { %v278_v62 = vpop.f32.mrb[7].mxu1  ;;  %305 = vmax.xlane.f32.xlu0 %v304_v60  ;;  %v284_v1 = vadd.f32 %v1283_v59, %v39_v61 }
 0x2c8   :  { %v1676_v63 = vadd.f32 %v278_v62, %v38_v57 }
 0x2c9   :  { %v313_v14 = vsel %vm297_vm3, %v284_v1, -inf }
 0x2ca   :  { %v1286_v2 = vpop.f32.mrb[8].mxu1  ;;  %v310_v3 = vsel %vm297_vm3, %v1676_v63, -inf }
 0x2cb   :  { %v288_v8 = vpop.f32.mrb[9].mxu1  ;;  %311 = vmax.xlane.f32.xlu1 %v310_v3  ;;  %308 = vmax.xlane.f32.xlu0 %v307_v4  ;;  %v1689_v12 = vadd.f32 %v1286_v2, %v41_v6 }
 0x2cc   :  { %v1687_v10 = vadd.f32 %v288_v8, %v40_v0 }
 0x2cd   :  { %v319_v15 = vsel %vm297_vm3, %v1689_v12, -inf }
 0x2ce   :  { %v316_v13 = vsel %vm297_vm3, %v1687_v10, -inf }
 0x2cf   :  { %317 = vmax.xlane.f32.xlu1 %v316_v13  ;;  %314 = vmax.xlane.f32.xlu0 %v313_v14 }
 0x2d3   :  { %320 = vmax.xlane.f32.xlu0 %v319_v15 }
 0x2e0   :  { %1472 = vrot.lane.b32.xlu1 %v1614_v17, %s1559_s14 }
 0x2e9   :  { %1477 = vrot.lane.b32.xlu0 %v1619_v23, %s1559_s14 }
 0x34f   :  { %v303_v16 = vpop.xlane.xlu1 %302 }
 0x350   :  { %v323_v18 = vsub.f32 %v264_v47, %v303_v16  ;;  %v300_v19 = vpop.xlane.xlu0 %299 }
 0x351   :  { %v322_v20 = vsub.f32 %v259_v49, %v300_v19 }
 0x352   :  { %v332_v21 = vmul.f32 1.442695, %v323_v18 }
 0x353   :  { %v330_v24 = vmul.f32 1.442695, %v322_v20 }
 0x354   :  { %1491 = vpow2.f32 %v332_v21  ;;  %v306_v25 = vpop.xlane.xlu0 %305 }
 0x355   :  { %1493 = vpow2.f32 %v330_v24  ;;  %v324_v27 = vsub.f32 %v269_v56, %v306_v25 }
 0x357   :  { %v334_v28 = vmul.f32 1.442695, %v324_v27 }
 0x358   :  { %v312_v29 = vpop.xlane.xlu1 %311  ;;  %v309_v30 = vpop.xlane.xlu0 %308 }
 0x359   :  { %1495 = vpow2.f32 %v334_v28  ;;  %v325_v31 = vsub.f32 %v274_v58, %v309_v30  ;;  %v326_v54 = vsub.f32 %v1676_v63, %v312_v29 }
 0x35b   :  { %v336_v32 = vmul.f32 1.442695, %v325_v31  ;;  %v338_v55 = vmul.f32 1.442695, %v326_v54 }
 0x35c   :  { %v318_v17 = vpop.xlane.xlu1 %317  ;;  %v315_v33 = vpop.xlane.xlu0 %314 }
 0x35d   :  { %v327_v34 = vsub.f32 %v284_v1, %v315_v33  ;;  %1497 = vpow2.f32 %v336_v32  ;;  %v328_v56 = vsub.f32 %v1687_v10, %v318_v17 }
 0x35e   :  { %v1700_v23 = vpop.eup %1491 }
 0x35f   :  { %v1494_v35 = vpop.eup %1493  ;;  %v340_v36 = vmul.f32 1.442695, %v327_v34  ;;  %v349_v37 = vsel %vm297_vm3, %v1700_v23, 0.0  ;;  %v342_v57 = vmul.f32 1.442695, %v328_v56 }
 0x360   :  { %v1473_v38 = vpop.permute.xlu1 %1472  ;;  %350 = vadd.xlane.f32.xlu0 %v349_v37  ;;  %v321_v39 = vpop.xlane.xlu0 %320  ;;  %v346_v40 = vsel %vm297_vm3, %v1494_v35, 0.0 }
 0x361   :  { %v1475_v41 = vunpack.i.h.bf16 %v1473_v38  ;;  %v1474_v42 = vunpack.i.l.bf16 %v1473_v38  ;;  %347 = vadd.xlane.f32.xlu1 %v346_v40  ;;  %1499 = vpow2.f32 %v340_v36  ;;  %v329_v58 = vsub.f32 %v1689_v12, %v321_v39  ;;  %v19_v38 = vld [vmem:[%s1834_s1 + $0x28] sm:$0xff]  ;;  %v18_v39 = vld [vmem:[%s1834_s1 + $0x20] sm:$0xff] }
 0x362   :  { %1501 = vpow2.f32 %v338_v55 }
 0x363   :  { %v1705_v43 = vpop.eup %1495  ;;  %v1397_v44 = vpack.c.bf16 %v1475_v41, %v1474_v42  ;;  %1503 = vpow2.f32 %v342_v57  ;;  %v344_v59 = vmul.f32 1.442695, %v329_v58 }
 0x364   :  { %v1478_v45 = vpop.permute.xlu0 %1477  ;;  %v352_v46 = vsel %vm297_vm3, %v1705_v43, 0.0 }
 0x365   :  { %v1480_v47 = vunpack.i.h.bf16 %v1478_v45  ;;  %v1479_v48 = vunpack.i.l.bf16 %v1478_v45  ;;  %1398 = vmatprep.subr.bf16.mxu0 %v1397_v44  ;;  %353 = vadd.xlane.f32.xlu1 %v352_v46  ;;  %1505 = vpow2.f32 %v344_v59  ;;  %v21_v45 = vld [vmem:[%s1834_s1 + $0x38] sm:$0xff] }
 0x366   :  { %1400 = vmatpush3.bf16.msra.mxu0 %v1397_v44  ;;  %v20_v44 = vld [vmem:[%s1834_s1 + $0x30] sm:$0xff] }
 0x367   :  { %v1401_v49 = vpack.c.bf16 %v1480_v47, %v1479_v48  ;;  %v1498_v50 = vpop.eup %1497 }
 0x368   :  { %v355_v51 = vsel %vm297_vm3, %v1498_v50, 0.0 }
 0x369   :  { %1402 = vmatprep.subr.bf16.mxu0 %v1401_v49  ;;  %356 = vadd.xlane.f32.xlu0 %v355_v51 }
 0x36a   :  { %1404 = vmatpush3.bf16.msra.mxu0 %v1401_v49 }
 0x36b   :  { %v1710_v52 = vpop.eup %1499 }
 0x36c   :  { %v361_v53 = vsel %vm297_vm3, %v1710_v52, 0.0  ;;  %v1502_v60 = vpop.eup %1501 }
 0x36d   :  { %362 = vadd.xlane.f32.xlu0 %v361_v53  ;;  %v358_v61 = vsel %vm297_vm3, %v1502_v60, 0.0  ;;  %v1504_v62 = vpop.eup %1503 }
 0x36f   :  { %v1506_v63 = vpop.eup %1505 }
 0x376   :  { %1482 = vrot.lane.b32.xlu1 %v1617_v22, %s1559_s14  ;;  %v364_v22 = vsel %vm297_vm3, %v1504_v62, 0.0 }
 0x383   :  { %1487 = vrot.lane.b32.xlu0 %v1623_v26, %s1559_s14  ;;  %v367_v26 = vsel %vm297_vm3, %v1506_v63, 0.0 }
 0x39a   :  { %359 = vadd.xlane.f32.xlu1 %v358_v61 }
 0x39e   :  { %365 = vadd.xlane.f32.xlu1 %v364_v22 }
 0x3a2   :  { %368 = vadd.xlane.f32.xlu1 %v367_v26 }
 0x3ed   :  { %v351_v2 = vpop.xlane.xlu0 %350 }
 0x3ee   :  { %v348_v0 = vpop.xlane.xlu1 %347 }
 0x3ef   :  { %1507 = vrcp.f32 %v348_v0 }
 0x3f0   :  { %1509 = vrcp.f32 %v351_v2 }
 0x3f2   :  { %v354_v1 = vpop.xlane.xlu1 %353 }
 0x3f3   :  { %1511 = vrcp.f32 %v354_v1 }
 0x3f6   :  { %v1483_v3 = vpop.permute.xlu1 %1482  ;;  %v357_v8 = vpop.xlane.xlu0 %356 }
 0x3f7   :  { %v1485_v4 = vunpack.i.h.bf16 %v1483_v3  ;;  %v1484_v6 = vunpack.i.l.bf16 %v1483_v3  ;;  %1513 = vrcp.f32 %v357_v8  ;;  %v23_v3 = vld [vmem:[%s1834_s1 + $0x48] sm:$0xff]  ;;  %v25_v8 = vld [vmem:[%s1834_s1 + $0x58] sm:$0xff] }
 0x3f9   :  { %v1508_v10 = vpop.eup %1507  ;;  %v1405_v12 = vpack.c.bf16 %v1485_v4, %v1484_v6  ;;  %v24_v6 = vld [vmem:[%s1834_s1 + $0x50] sm:$0xff] }
 0x3fa   :  { %v378_v13 = vmul.f32 %v1508_v10, %v1494_v35  ;;  %v363_v14 = vpop.xlane.xlu0 %362  ;;  %v1510_v20 = vpop.eup %1509  ;;  %v1417_v10 = vpack.c.bf16 %v25_v8, %v24_v6 }
 0x3fb   :  { %1406 = vmatprep.subr.bf16.mxu0 %v1405_v12  ;;  %v379_v24 = vmul.f32 %v1510_v20, %v1700_v23  ;;  %1515 = vrcp.f32 %v363_v14  ;;  %v28_v14 = vld [vmem:[%s1834_s1 + $0x70] sm:$0xff]  ;;  %v31_v20 = vld [vmem:[%s1834_s1 + $0x88] sm:$0xff] }
 0x3fc   :  { %1408 = vmatpush3.bf16.msra.mxu0 %v1405_v12  ;;  %1303 = vmatprep.mubr.msk.f32.mxu0 %vm297_vm3, %v378_v13  ;;  %v26_v12 = vld [vmem:[%s1834_s1 + $0x60] sm:$0xff]  ;;  %v27_v13 = vld [vmem:[%s1834_s1 + $0x68] sm:$0xff] }
 0x3fd   :  { %v1512_v21 = vpop.eup %1511 }
 0x3fe   :  { %v1488_v15 = vpop.permute.xlu0 %1487  ;;  %v380_v27 = vmul.f32 %v1512_v21, %v1705_v43 }
 0x3ff   :  { %v1490_v16 = vunpack.i.h.bf16 %v1488_v15  ;;  %v1489_v18 = vunpack.i.l.bf16 %v1488_v15  ;;  %v1421_v15 = vpack.c.bf16 %v27_v13, %v26_v12 }
 0x401   :  { %v1409_v19 = vpack.c.bf16 %v1490_v16, %v1489_v18  ;;  %v1514_v25 = vpop.eup %1513  ;;  %v29_v16 = vld [vmem:[%s1834_s1 + $0x78] sm:$0xff]  ;;  %1422 = vmatprep.subr.bf16.mxu1 %v1421_v15 }
 0x402   :  { %v381_v28 = vmul.f32 %v1514_v25, %v1498_v50  ;;  %v869_v50 = vsub.s32 1, %v1604_v9  ;;  %v1425_v18 = vpack.c.bf16 %v29_v16, %v28_v14  ;;  %1424 = vmatpush3.bf16.msra.mxu1 %v1421_v15  ;;  %v1116_v14 = vsub.s32 6, %v1604_v9 }
 0x403   :  { %1410 = vmatprep.subr.bf16.mxu0 %v1409_v19  ;;  %v1122_v15 = vsub.s32 7, %v1604_v9 }
 0x404   :  { %1412 = vmatpush3.bf16.msra.mxu0 %v1409_v19  ;;  %v870_v51 = vrot.slane %v1610_v11, %v869_v50  ;;  %v30_v19 = vld [vmem:[%s1834_s1 + $0x80] sm:$0xff]  ;;  %1426 = vmatprep.subr.bf16.mxu1 %v1425_v18  ;;  %v1117_v16 = vrot.slane %v1610_v11, %v1116_v14 }
 0x405   :  { %v1516_v32 = vpop.eup %1515  ;;  %1315 = vmatprep.subr.mxu0 %v19_v38  ;;  %v1429_v21 = vpack.c.bf16 %v31_v20, %v30_v19  ;;  %v1123_v20 = vrot.slane %v1610_v11, %v1122_v15 }
 0x406   :  { %v383_v34 = vmul.f32 %v1516_v32, %v1710_v52  ;;  %1428 = vmatpush3.bf16.msra.mxu1 %v1425_v18  ;;  %v910_v32 = vsub.s32 3, %v1604_v9 }
 0x407   :  { %1304 = vmatmul.mubr.msk.f32.vlgmr.msra.gmra.mrb[0].mxu0 %vm297_vm3, %v379_v24  ;;  %1430 = vmatprep.subr.bf16.mxu1 %v1429_v21 }
 0x408   :  { %1306 = vmatprep.mubr.msk.f32.mxu0 %vm297_vm3, %v380_v27  ;;  %1316 = vmatpush3.msra.mxu0 %v19_v38 }
 0x409   :  { %1320 = vmatprep.subr.mxu0 %v18_v39 }
 0x40a   :  { %1432 = vmatpush3.bf16.msra.mxu1 %v1429_v21 }
 0x40b   :  { %1307 = vmatmul.mubr.msk.f32.gmra.mrb[2].mxu0 %vm297_vm3, %v381_v28 }
 0x427   :  { %v360_v29 = vpop.xlane.xlu1 %359 }
 0x428   :  { %1517 = vrcp.f32 %v360_v29 }
 0x42b   :  { %v366_v30 = vpop.xlane.xlu1 %365 }
 0x42c   :  { %1519 = vrcp.f32 %v366_v30 }
 0x42f   :  { %v369_v31 = vpop.xlane.xlu1 %368 }
 0x430   :  { %1521 = vrcp.f32 %v369_v31  ;;  %v904_v31 = vsub.s32 2, %v1604_v9 }
 0x432   :  { %v1518_v17 = vpop.eup %1517 }
 0x433   :  { %v382_v33 = vmul.f32 %v1518_v17, %v1502_v60  ;;  %v905_v17 = vrot.slane %v1610_v11, %v904_v31 }
 0x435   :  { %1309 = vmatprep.mubr.msk.f32.mxu0 %vm297_vm3, %v382_v33 }
 0x436   :  { %v1520_v23 = vpop.eup %1519  ;;  %1310 = vmatmul.mubr.msk.f32.gmra.mrb[4].mxu0 %vm297_vm3, %v383_v34 }
 0x437   :  { %v384_v35 = vmul.f32 %v1520_v23, %v1504_v62  ;;  %v911_v23 = vrot.slane %v1610_v11, %v910_v32 }
 0x439   :  { %1312 = vmatprep.mubr.msk.f32.mxu0 %vm297_vm3, %v384_v35 }
 0x43a   :  { %v1522_v36 = vpop.eup %1521 }
 0x43b   :  { %v385_v37 = vmul.f32 %v1522_v36, %v1506_v63 }
 0x43d   :  { %1313 = vmatmul.mubr.msk.f32.gmra.mrb[6].mxu0 %vm297_vm3, %v385_v37 }
 0x4da   :  { %v1305_v40 = vpop.f32.mrb[0].mxu0 }
 0x4db   :  { %v500_v41 = vpop.f32.mrb[1].mxu0 }
 0x4de   :  { %v1308_v42 = vpop.f32.mrb[2].mxu0 }
 0x4df   :  { %v510_v43 = vpop.f32.mrb[3].mxu0 }
 0x4e0   :  { %1317 = vmatprep.mubr.msk.f32.mxu0 %vm159_vm1, %v510_v43 }
 0x4e1   :  { %1318 = vmatmul.mubr.msk.f32.vlgmr.msra.gmra.mrb[8].mxu0 %vm159_vm1, %v1308_v42  ;;  %v33_v42 = vld [vmem:[%s1834_s1 + $0x98] sm:$0xff] }
 0x4e2   :  { %1322 = vmatprep.mubr.msk.f32.mxu0 %vm159_vm1, %v500_v41  ;;  %1321 = vmatpush3.msra.mxu0 %v18_v39  ;;  %v32_v41 = vld [vmem:[%s1834_s1 + $0x90] sm:$0xff] }
 0x4e3   :  { %1325 = vmatprep.subr.mxu0 %v20_v44  ;;  %v1433_v43 = vpack.c.bf16 %v33_v42, %v32_v41 }
 0x4e5   :  { %1434 = vmatprep.subr.bf16.mxu1 %v1433_v43 }
 0x4e6   :  { %1436 = vmatpush3.bf16.msra.mxu1 %v1433_v43 }
 0x4e9   :  { %1323 = vmatmul.mubr.msk.f32.vlgmr.msra.gmra.mrb[8].mxu0 %vm159_vm1, %v1305_v40 }
 0x4ea   :  { %1326 = vmatpush3.msra.mxu0 %v20_v44  ;;  %v916_v44 = vsub.s32 4, %v1604_v9 }
 0x4eb   :  { %1330 = vmatprep.subr.mxu0 %v21_v45 }
 0x509   :  { %v1311_v46 = vpop.f32.mrb[4].mxu0 }
 0x50a   :  { %v520_v47 = vpop.f32.mrb[5].mxu0 }
 0x50b   :  { %1327 = vmatprep.mubr.msk.f32.mxu0 %vm159_vm1, %v520_v47 }
 0x50c   :  { %1328 = vmatmul.mubr.msk.f32.vlgmr.msra.gmra.mrb[8].mxu0 %vm159_vm1, %v1311_v46 }
 0x50d   :  { %1331 = vmatpush3.msra.mxu0 %v21_v45  ;;  %v917_v45 = vrot.slane %v1610_v11, %v916_v44 }
 0x510   :  { %v1314_v48 = vpop.f32.mrb[6].mxu0 }
 0x511   :  { %v530_v49 = vpop.f32.mrb[7].mxu0 }
 0x512   :  { %1332 = vmatprep.mubr.msk.f32.mxu0 %vm159_vm1, %v530_v49 }
 0x514   :  { %1333 = vmatmul.mubr.msk.f32.vlgmr.msra.gmra.mrb[8].mxu0 %vm159_vm1, %v1314_v48 }
 0x5e7   :  { %v1334_v52 = vpop.f32.mrb[8].mxu0 }
 0x5e8   :  { %v856_v53 = vpop.f32.mrb[9].mxu0  ;;  %v872_v54 = vadd.f32 %v1334_v52, %v870_v51  ;;  %v1003_v52 = vsub.s32 5, %v1604_v9 }
 0x5e9   :  { %v871_v55 = vadd.f32 %v870_v51, %v856_v53 }
 0x5ea   :  { %v874_v58 = vadd.f32 %v872_v54, %v1600_v7  ;;  %v22_v7 = vld [vmem:[%s1834_s1 + $0x40] sm:$0xff]  ;;  %v1004_v53 = vrot.slane %v1610_v11, %v1003_v52  ;;  %s1560_s1 = smov [#allocation2]  }
 0x5eb   :  { %v873_v56 = vadd.f32 %v871_v55, %v1593_v5  ;;  %v1413_v4 = vpack.c.bf16 %v23_v3, %v22_v7  ;;  %s1133_s18 = sshll.u32 %s1560_s1, 4  ;;  %s1134_s18 = int_to_ptr.vmem [resolvable:$true] %s1133_s18 }
 0x5ec   :  { %v878_v59 = vsel %vm47_vm0, %v874_v58, 0.0  ;;  %s1531_s19 = scalar_lea.vmem %s1134_s18, 256  ;;  %p1536_p1 = scmp.lt.s32.totalorder %s1134_s18, %s1134_s18 }
 0x5ed   :  { %v875_v57 = vsel %vm47_vm0, %v873_v56, 0.0  ;;  %1414 = vmatprep.subr.bf16.mxu0 %v1413_v4  ;;  %p1532_p0 = scmp.ne.s32.totalorder %s1134_s18, %s1531_s19  ;;  %p1537_p2 = scmp.lt.s32.totalorder %s1531_s19, %s1531_s19 }
 0x5ee   :  { %876 = vadd.xlane.f32.xlu1 %v875_v57  ;;  %1416 = vmatpush3.bf16.msra.mxu0 %v1413_v4 }
 0x5ef   :  { %1418 = vmatprep.subr.bf16.mxu0 %v1417_v10  ;;  %p1538_p3 = por %p1537_p2, %p1536_p1 }
 0x5f1   :  { %p1539_p4 = pnand %p1538_p3, %p1532_p0 }
 0x5f2   :  { %879 = vadd.xlane.f32.xlu1 %v878_v59  ;;  %1420 = vmatpush3.bf16.msra.mxu0 %v1417_v10 }
 0x67b   :  { %v877_v60 = vpop.xlane.xlu1 %876 }
 0x67c   :  { %v882_v61 = vmul.f32 0.03125, %v877_v60 }
 0x67e   :  { %v884_v62 = vsub.f32 %v873_v56, %v882_v61 }
 0x67f   :  { %v880_v22 = vpop.xlane.xlu1 %879 }
 0x680   :  { %v883_v63 = vmul.f32 0.03125, %v880_v22  ;;  %v886_v26 = vmul.f32 %v884_v62, %v884_v62 }
 0x682   :  { %v885_v0 = vsub.f32 %v874_v58, %v883_v63  ;;  %v888_v1 = vsel %vm47_vm0, %v886_v26, 0.0 }
 0x683   :  { %889 = vadd.xlane.f32.xlu1 %v888_v1 }
 0x684   :  { %v887_v2 = vmul.f32 %v885_v0, %v885_v0 }
 0x686   :  { %v891_v5 = vsel %vm47_vm0, %v887_v2, 0.0 }
 0x687   :  { %892 = vadd.xlane.f32.xlu1 %v891_v5 }
 0x710   :  { %v890_v24 = vpop.xlane.xlu1 %889 }
 0x711   :  { %v894_v25 = vmul.f32 0.03125, %v890_v24 }
 0x713   :  { %v896_v27 = vadd.f32 1e-05, %v894_v25 }
 0x714   :  { %v893_v28 = vpop.xlane.xlu1 %892 }
 0x715   :  { %1523 = vrsqrt.f32 %v896_v27  ;;  %v895_v29 = vmul.f32 0.03125, %v893_v28 }
 0x717   :  { %v897_v30 = vadd.f32 1e-05, %v895_v29 }
 0x719   :  { %1525 = vrsqrt.f32 %v897_v30 }
 0x71f   :  { %v1524_v33 = vpop.eup %1523 }
 0x720   :  { %v900_v34 = vmul.f32 %v1524_v33, %v884_v62 }
 0x722   :  { %v906_v35 = vmul.f32 %v905_v17, %v900_v34 }
 0x723   :  { %v1526_v36 = vpop.eup %1525 }
 0x724   :  { %v901_v37 = vmul.f32 %v1526_v36, %v885_v0  ;;  %v912_v38 = vadd.f32 %v911_v23, %v906_v35 }
 0x726   :  { %v907_v39 = vmul.f32 %v905_v17, %v901_v37  ;;  %1343 = vmatprep.mubr.msk.f32.mxu0 %vm47_vm0, %v912_v38 }
 0x728   :  { %v913_v40 = vadd.f32 %v911_v23, %v907_v39 }
 0x72a   :  { %1344 = vmatmul.mubr.msk.f32.vlgmr.msra.gmra.mrb[10].mxu0 %vm47_vm0, %v913_v40 }
 0x7fd   :  { %v1345_v46 = vpop.f32.mrb[10].mxu0 }
 0x7fe   :  { %v996_v47 = vadd.f32 %v1345_v46, %v917_v45  ;;  %v990_v48 = vpop.f32.mrb[11].mxu0 }
 0x7ff   :  { %v991_v49 = vadd.f32 %v990_v48, %v917_v45 }
 0x800   :  { %v1000_v51 = vmax.f32 %v996_v47, 0.0 }
 0x801   :  { %v999_v50 = vmax.f32 %v991_v49, 0.0 }
 0x803   :  { %1362 = vmatprep.mubr.msk.f32.mxu1 %vm297_vm3, %v999_v50 }
 0x804   :  { %1363 = vmatmul.mubr.msk.f32.vlgmr.msra.gmra.mrb[10].mxu1 %vm297_vm3, %v1000_v51 }
 0x8d7   :  { %v1364_v54 = vpop.f32.mrb[10].mxu1 }
 0x8d8   :  { %v1083_v55 = vadd.f32 %v1364_v54, %v1004_v53  ;;  %v1077_v56 = vpop.f32.mrb[11].mxu1 }
 0x8d9   :  { %v1078_v57 = vadd.f32 %v1077_v56, %v1004_v53 }
 0x8da   :  { %v1087_v58 = vadd.f32 %v1083_v55, %v913_v40 }
 0x8db   :  { %v1086_v59 = vadd.f32 %v1078_v57, %v912_v38 }
 0x8dc   :  { %v1091_v60 = vsel %vm47_vm0, %v1087_v58, 0.0 }
 0x8dd   :  { %1092 = vadd.xlane.f32.xlu1 %v1091_v60  ;;  %v1088_v61 = vsel %vm47_vm0, %v1086_v59, 0.0 }
 0x8de   :  { %1089 = vadd.xlane.f32.xlu0 %v1088_v61 }
 0x96a   :  { %v1093_v62 = vpop.xlane.xlu1 %1092 }
 0x96b   :  { %v1095_v22 = vmul.f32 0.03125, %v1093_v62  ;;  %v1090_v63 = vpop.xlane.xlu0 %1089 }
 0x96c   :  { %v1094_v26 = vmul.f32 0.03125, %v1090_v63 }
 0x96d   :  { %v1097_v0 = vsub.f32 %v1087_v58, %v1095_v22 }
 0x96e   :  { %v1096_v1 = vsub.f32 %v1086_v59, %v1094_v26 }
 0x96f   :  { %v1099_v7 = vmul.f32 %v1097_v0, %v1097_v0 }
 0x970   :  { %v1098_v2 = vmul.f32 %v1096_v1, %v1096_v1 }
 0x971   :  { %v1103_v3 = vsel %vm47_vm0, %v1099_v7, 0.0 }
 0x972   :  { %v1100_v5 = vsel %vm47_vm0, %v1098_v2, 0.0 }
 0x973   :  { %1101 = vadd.xlane.f32.xlu1 %v1100_v5 }
 0x977   :  { %1104 = vadd.xlane.f32.xlu1 %v1103_v3 }
 0xa00   :  { %v1102_v4 = vpop.xlane.xlu1 %1101 }
 0xa01   :  { %v1106_v6 = vmul.f32 0.03125, %v1102_v4 }
 0xa03   :  { %v1108_v8 = vadd.f32 1e-05, %v1106_v6 }
 0xa04   :  { %v1105_v10 = vpop.xlane.xlu1 %1104 }
 0xa05   :  { %1527 = vrsqrt.f32 %v1108_v8  ;;  %v1107_v12 = vmul.f32 0.03125, %v1105_v10 }
 0xa07   :  { %v1109_v13 = vadd.f32 1e-05, %v1107_v12 }
 0xa09   :  { %1529 = vrsqrt.f32 %v1109_v13 }
 0xa0f   :  { %v1528_v18 = vpop.eup %1527 }
 0xa10   :  { %v1112_v19 = vmul.f32 %v1528_v18, %v1096_v1 }
 0xa12   :  { %v1118_v21 = vmul.f32 %v1117_v16, %v1112_v19 }
 0xa13   :  { %v1530_v24 = vpop.eup %1529 }
 0xa14   :  { %v1113_v25 = vmul.f32 %v1530_v24, %v1097_v0  ;;  %v1124_v27 = vadd.f32 %v1123_v20, %v1118_v21 }
 0xa16   :  { %v1119_v28 = vmul.f32 %v1117_v16, %v1113_v25  ;;  %1126 = vst.msk [vmem:[#allocation2] sm:$0xff] %vm47_vm0, %v1124_v27 }
 0xa18   :  { %v1125_v29 = vadd.f32 %v1123_v20, %v1119_v28 }
 0xa1a   :  { %1127 = vst.msk [vmem:[#allocation2 + $0x8] sm:$0xff] %vm47_vm0, %v1125_v29 }
 0xa1b   :  { %1542 = shalt.err (!%p1539_p4)
}
 0xa1c   :  { %s1543_s22 = scalar_lea.hbm %s1835_s2, 256 }
 0xa1d   :  { %p1544_p5 = scmp.ne.s32.totalorder %s1835_s2, %s1543_s22  ;;  %p1547_p6 = scmp.lt.u32.totalorder %s1543_s22, %s1835_s2 }
 0xa1f   :  { %p1549_p7 = pnand %p1547_p6, %p1544_p5 }
 0xa21   :  { %1552 = shalt.err (!%p1549_p7)
}
 0xa22   :  { %s1561_s26 = smov 128   ;;  %s1562_s27 = smov 8  }
 0xa23   :  { %1139 = dma.vmem_to_hbm [thread:$0]  %s1134_s18, 256, %s1835_s2, [#allocation3], %s1561_s26, %s1561_s26, %s1562_s27  }
 0xa24   :  { %1553 = dma.done.wait [#allocation3], 256  }
 0xa25   :  { %1554 = vsyncadd [#allocation3], 4294967040 }
 0xa26   :  { %1143 = vsyncpa [#allocation3], 1 }

</bundles_post_ra>
